<compile_context>
chip_gen: v7x
topology: tpu7x:2x2x1
jax: 0.10.0
libtpu: 0.0.40
codegen_flags: <defaults>
</compile_context>

<pallas_src>
import functools

import numpy as np

import jax
import jax.numpy as jnp
from jax.experimental import pallas as pl
from jax.experimental.pallas import tpu as pltpu

_LANE = 128
_MIB = 1 << 20


# --------------------------------------------------------------------------- helpers
def _round_up(v, m):
    return ((v + m - 1) // m) * m


def _pad2d(a, rows, cols):
    pr, pc = rows - a.shape[0], cols - a.shape[1]
    if pr or pc:
        a = jnp.pad(a, ((0, pr), (0, pc)))
    return a


def _pick_block(base, n_blocks, cap):
    """Largest multiple of `base` that divides base*n_blocks and is <= cap."""
    best = 1
    for f in range(1, n_blocks + 1):
        if n_blocks % f == 0 and base * f <= cap:
            best = f
    return base * best


def _vmem_budget(tm, tk, tn, a_bytes, b_bytes, out_bytes):
    """Scoped-VMEM request: double-buffered inputs/outputs + f32 acc, 2x headroom."""
    need = (2 * tm * tk * a_bytes + 2 * tk * tn * b_bytes
            + tm * tn * 4 + 2 * tm * tn * out_bytes)
    return int(min(max(2 * need, 16 * _MIB), 48 * _MIB))  # stay under v7x 64 MiB physical


# --------------------------------------------------------------------------- dense matmul
def _mm_kernel(a_ref, b_ref, o_ref, acc_ref, *, apply_relu):
    """One (tm, tn) output tile; reduction over grid axis 2 with an f32 VMEM accumulator."""
    k = pl.program_id(2)

    @pl.when(k == 0)
    def _():
        acc_ref[...] = jnp.zeros_like(acc_ref)

    acc_ref[...] += jnp.dot(a_ref[...], b_ref[...], preferred_element_type=jnp.float32)

    @pl.when(k == pl.num_programs(2) - 1)
    def _():
        z = acc_ref[...]
        if apply_relu:
            z = jnp.maximum(z, 0.0)
        o_ref[...] = z.astype(o_ref.dtype)


def _mm_single_step_kernel(a_ref, b_ref, o_ref, *, apply_relu):
    """Specialisation when the k grid is 1: no scratch, no init/finalize."""
    z = jnp.dot(a_ref[...], b_ref[...], preferred_element_type=jnp.float32)
    if apply_relu:
        z = jnp.maximum(z, 0.0)
    o_ref[...] = z.astype(o_ref.dtype)


def _tiled_matmul(a, b, *, tm, tk, tn, apply_relu, out_dtype, vmem_limit):
    """out = [relu](a @ b), tile-aligned shapes, (tm, tk, tn) tiling, reduction axis last."""
    m, k = a.shape
    k2, n = b.shape
    assert k == k2 and m % tm == 0 and k % tk == 0 and n % tn == 0
    grid = (m // tm, n // tn, k // tk)
    single = grid[2] == 1
    kernel = _mm_single_step_kernel if single else _mm_kernel
    scratch = [] if single else [pltpu.VMEM((tm, tn), jnp.float32)]
    return pl.pallas_call(
        functools.partial(kernel, apply_relu=apply_relu),
        out_shape=jax.ShapeDtypeStruct((m, n), out_dtype),
        grid=grid,
        in_specs=[
            pl.BlockSpec((tm, tk), lambda i, j, kk: (i, kk)),
            pl.BlockSpec((tk, tn), lambda i, j, kk: (kk, j)),
        ],
        out_specs=pl.BlockSpec((tm, tn), lambda i, j, kk: (i, j)),
        scratch_shapes=scratch,
        compiler_params=pltpu.CompilerParams(
            dimension_semantics=("parallel", "parallel", "arbitrary"),
            vmem_limit_bytes=vmem_limit,
        ),
    )(a, b)


# --------------------------------------------------------------------------- block-sparse A @ H
def _agg_kernel(kmap_ref, kcnt_ref, a_ref, h_ref, o_ref, acc_ref, *,
                apply_relu, compute_dtype):
    """out[i] = [relu](sum_s A[i, kmap[i,s]] @ H[kmap[i,s]]); A tile is int8, cast in-kernel."""
    i = pl.program_id(0)
    s = pl.program_id(2)

    @pl.when(s == 0)
    def _():
        acc_ref[...] = jnp.zeros_like(acc_ref)

    @pl.when(s < kcnt_ref[i])  # skip MXU work on padded schedule steps
    def _():
        acc_ref[...] += jnp.dot(a_ref[...].astype(compute_dtype), h_ref[...],
                                preferred_element_type=jnp.float32)

    @pl.when(s == pl.num_programs(2) - 1)
    def _():
        z = acc_ref[...]
        if apply_relu:
            z = jnp.maximum(z, 0.0)
        o_ref[...] = z.astype(o_ref.dtype)


def _build_tile_schedule(a_i8, tm, tk):
    """Per row-tile compacted list of nonzero (tm, tk) A tiles.

    Host-side (tiny [gi, gk] table is pulled back once).  In production keep this
    resident alongside the int8 adjacency; not usable under jit on `a_i8`.
    """
    m, k = a_i8.shape
    gi, gk = m // tm, k // tk
    tile_nz = jnp.any(a_i8.reshape(gi, tm, gk, tk) != 0, axis=(1, 3))
    tile_nz = np.asarray(jax.device_get(tile_nz))
    kcnt = tile_nz.sum(axis=1).astype(np.int32)
    max_s = max(int(kcnt.max()), 1)
    kmap = np.zeros((gi, max_s), dtype=np.int32)
    for i in range(gi):
        idx = np.nonzero(tile_nz[i])[0]
        if idx.size:
            kmap[i, :idx.size] = idx
            kmap[i, idx.size:] = idx[-1]  # repeat last index -> no extra DMA on padded steps
    return jnp.asarray(kmap, dtype=jnp.int32), jnp.asarray(kcnt, dtype=jnp.int32)


def _block_sparse_aggregate(a_i8, h, kmap, kcnt, *, tm, tk, tn, apply_relu,
                            out_dtype, vmem_limit):
    """out = [relu](A @ H) visiting only the nonzero A tiles listed in (kmap, kcnt)."""
    m, k = a_i8.shape
    k2, n = h.shape
    assert k == k2 and m % tm == 0 and k % tk == 0 and n % tn == 0
    gi, gj, gs = m // tm, n // tn, kmap.shape[1]
    grid_spec = pltpu.PrefetchScalarGridSpec(
        num_scalar_prefetch=2,
        grid=(gi, gj, gs),
        in_specs=[
            pl.BlockSpec((tm, tk), lambda i, j, s, kmap, kcnt: (i, kmap[i, s])),
            pl.BlockSpec((tk, tn), lambda i, j, s, kmap, kcnt: (kmap[i, s], j)),
        ],
        out_specs=pl.BlockSpec((tm, tn), lambda i, j, s, kmap, kcnt: (i, j)),
        scratch_shapes=[pltpu.VMEM((tm, tn), jnp.float32)],
    )
    return pl.pallas_call(
        functools.partial(_agg_kernel, apply_relu=apply_relu, compute_dtype=h.dtype),
        out_shape=jax.ShapeDtypeStruct((m, n), out_dtype),
        grid_spec=grid_spec,
        compiler_params=pltpu.CompilerParams(
            dimension_semantics=("parallel", "parallel", "arbitrary"),
            vmem_limit_bytes=vmem_limit,
        ),
    )(kmap, kcnt, a_i8, h)


# --------------------------------------------------------------------------- forward
def gcn_forward(adj, x, w, *, node_tile=512, k_tile=1024,
                intermediate_dtype=jnp.bfloat16):
    """GCN forward: ReLU((adj @ x) @ w.T).

    adj: [N, N] 0/1 (any dtype; kept/DMA'd as int8), x: [N, in_feats],
    w: [out_feats, in_feats] (PyTorch Linear convention). Returns [N, out_feats] f32.
    """
    n, in_feats = x.shape
    out_feats, in_feats_w = w.shape
    assert in_feats_w == in_feats and adj.shape == (n, n)

    # ---- tile / padding geometry --------------------------------------------
    node_tile = max(int(node_tile), _LANE)
    n128 = _round_up(n, _LANE)
    tm = _round_up(min(node_tile, n128), _LANE)
    # Keep >= 2 row tiles when possible so the parallel i-axis splits across the
    # two v7x TensorCores (and pipelines better everywhere).
    if n128 // tm < 2 and n128 >= 2 * _LANE:
        tm = _round_up(n128 // 2, _LANE)
    n_pad = _round_up(n, tm)
    tk_nodes = _pick_block(tm, n_pad // tm, max(int(k_tile), tm))

    f_in = _round_up(in_feats, _LANE)
    # v6e/v7x MXU output width is 256: pad f_out to 256 once it exceeds one lane tile.
    f_out = _round_up(out_feats, 256 if out_feats > _LANE else _LANE)
    tn_out = _pick_block(_LANE, f_out // _LANE, 256)
    tn_in = _pick_block(_LANE, f_in // _LANE, 256)
    tk_in = _pick_block(_LANE, f_in // _LANE, 512)

    # ---- wrapper-side layout plumbing ----------------------------------------
    cdt = intermediate_dtype
    # Adjacency is kept/DMA'd as int8 (exact for 0/1); cast to bf16 happens in-kernel.
    # If the caller already keeps A resident as int8 (as in __main__) this is a cheap
    # pad-only pass; the f32 -> int8 conversion is a one-time cost otherwise.
    a_i8 = adj if adj.dtype == jnp.int8 else adj.astype(jnp.int8)
    a_i8 = _pad2d(a_i8, n_pad, n_pad)
    x_p = _pad2d(x, n_pad, f_in).astype(cdt)
    wt_p = _pad2d(w.T, f_in, f_out).astype(cdt)  # pre-transposed: no in-kernel relayout

    # (A @ X) @ W.T == A @ (X @ W.T): keep the dominant N x N matmul as narrow as possible.
    if out_feats <= in_feats:
        # Project first: H = X @ W.T, then block-sparse aggregate: ReLU(A @ H).
        h = _tiled_matmul(
            x_p, wt_p, tm=tm, tk=tk_in, tn=tn_out, apply_relu=False,
            out_dtype=cdt, vmem_limit=_vmem_budget(tm, tk_in, tn_out, 2, 2, 2))
        kmap, kcnt = _build_tile_schedule(a_i8, tm, tk_nodes)
        out_p = _block_sparse_aggregate(
            a_i8, h, kmap, kcnt, tm=tm, tk=tk_nodes, tn=tn_out, apply_relu=True,
            out_dtype=jnp.float32, vmem_limit=_vmem_budget(tm, tk_nodes, tn_out, 1, 2, 4))
    else:
        # Aggregate first: AGG = A @ X (block-sparse), then project: ReLU(AGG @ W.T).
        kmap, kcnt = _build_tile_schedule(a_i8, tm, tk_nodes)
        agg = _block_sparse_aggregate(
            a_i8, x_p, kmap, kcnt, tm=tm, tk=tk_nodes, tn=tn_in, apply_relu=False,
            out_dtype=cdt, vmem_limit=_vmem_budget(tm, tk_nodes, tn_in, 1, 2, 2))
        out_p = _tiled_matmul(
            agg, wt_p, tm=tm, tk=tk_in, tn=tn_out, apply_relu=True,
            out_dtype=jnp.float32, vmem_limit=_vmem_budget(tm, tk_in, tn_out, 2, 2, 4))

    # TODO(synk): support a true CSR/edge-list graph (gather-based aggregation) instead of
    # a dense 0/1 adjacency for very large, very sparse graphs.
    return out_p[:n, :out_feats]


# --------------------------------------------------------------------------- demo / test
if __name__ == "__main__":
    key = jax.random.PRNGKey(0)
    k_adj, k_x, k_w = jax.random.split(key, 3)

    # Small, deterministic synthetic problem (partial graph as dense adjacency).
    N = 64          # number of nodes
    IN_FEATS = 32   # input feature dim
    OUT_FEATS = 16  # output feature dim

    # Keep the adjacency resident as int8 (0/1) -- the format the kernel DMAs directly.
    adj_i8 = (jax.random.uniform(k_adj, (N, N)) < 0.1).astype(jnp.int8)
    x = jax.random.normal(k_x, (N, IN_FEATS), dtype=jnp.float32)
    bound = 1.0 / float(np.sqrt(IN_FEATS))
    w = jax.random.uniform(
        k_w, (OUT_FEATS, IN_FEATS), minval=-bound, maxval=bound, dtype=jnp.float32)

    out = gcn_forward(adj_i8, x, w)
    out = jax.block_until_ready(out)

    # Reference (plain JAX, f32, original op order).  Tolerance covers the documented
    # bf16 intermediates (X, W, H); A itself is exact 0/1.
    ref = jnp.maximum((adj_i8.astype(jnp.float32) @ x) @ w.T, 0.0)
    assert out.shape == (N, OUT_FEATS)
    assert out.dtype == jnp.float32
    assert jnp.allclose(out, ref, atol=5e-2, rtol=5e-2), float(jnp.max(jnp.abs(out - ref)))

    print("KERNEL_OK")
</pallas_src>

<mosaic_0001>
module attributes {stable_mosaic.version = 11 : i64} {
  func.func @_mm_single_step_kernel(%arg0: i32, %arg1: i32, %arg2: i32, %arg3: memref<128x128xbf16, #tpu.memory_space<vmem>>, %arg4: memref<128x128xbf16, #tpu.memory_space<vmem>>, %arg5: memref<128x128xbf16, #tpu.memory_space<vmem>>) attributes {dimension_semantics = [#tpu.dimension_semantics<parallel>, #tpu.dimension_semantics<parallel>, #tpu.dimension_semantics<arbitrary>], iteration_bounds = array<i64: 1, 1, 1>, scalar_prefetch = 0 : i64, scratch_operands = 0 : i64, tpu.core_type = #tpu.core_type<tc>, window_params = [{transform_indices = @transform_0, window_bounds = array<i64: 128, 128>}, {transform_indices = @transform_1, window_bounds = array<i64: 128, 128>}, {transform_indices = @transform_2, window_bounds = array<i64: 128, 128>}]} {
    %c0 = arith.constant 0 : index
    %c0_0 = arith.constant 0 : index
    %0 = vector.load %arg3[%c0, %c0_0] : memref<128x128xbf16, #tpu.memory_space<vmem>>, vector<128x128xbf16>
    %c0_1 = arith.constant 0 : index
    %c0_2 = arith.constant 0 : index
    %1 = vector.load %arg4[%c0_1, %c0_2] : memref<128x128xbf16, #tpu.memory_space<vmem>>, vector<128x128xbf16>
    %cst = arith.constant dense<0.000000e+00> : vector<128x128xf32>
    %2 = tpu.matmul %0, %1, %cst {dimension_numbers = #tpu.dot_dimension_numbers<[1], [0], [0], [1], [0, 0, 1, 1], [], []>} : vector<128x128xbf16>, vector<128x128xbf16>, vector<128x128xf32> -> vector<128x128xf32>
    %3 = arith.truncf %2 : vector<128x128xf32> to vector<128x128xbf16>
    %c0_3 = arith.constant 0 : index
    %c0_4 = arith.constant 0 : index
    %4 = vector.load %arg5[%c0_3, %c0_4] : memref<128x128xbf16, #tpu.memory_space<vmem>>, vector<128x128xbf16>
    tpu.vector_store %arg5[%c0_3, %c0_4], %3 {strides = array<i32>} : memref<128x128xbf16, #tpu.memory_space<vmem>>, vector<128x128xbf16>,
    return
  }
  func.func @transform_0(%arg0: i32, %arg1: i32, %arg2: i32) -> (i32, i32) {
    %c0_i32 = arith.constant 0 : i32
    return %arg0, %arg2 : i32, i32
  }
  func.func @transform_1(%arg0: i32, %arg1: i32, %arg2: i32) -> (i32, i32) {
    %c0_i32 = arith.constant 0 : i32
    return %arg2, %arg1 : i32, i32
  }
  func.func @transform_2(%arg0: i32, %arg1: i32, %arg2: i32) -> (i32, i32) {
    %c0_i32 = arith.constant 0 : i32
    return %arg0, %arg1 : i32, i32
  }
}

</mosaic_0001>

<bundles_post_ra>
// kernel: tpu_custom_call.1
= control target key start
LH: loop header
LB: loop body
LE: loop exit
PB: predicated region body
PF: predicated region fallthrough
CT: control target
= control target key end

     0   :  { %7 = vsyncpa [#allocation3], 0  ;;  %s681_s0 = inlined_call_operand.hbm [shape: bf16[128,128], index: 0, kind: input, shape index: {}]   ;;  %s682_s1 = inlined_call_operand.hbm [shape: bf16[128,128], index: 1, kind: input, shape index: {}]   ;;  %s683_s2 = inlined_call_operand.hbm [shape: bf16[128,128], index: 2, kind: output, shape index: {}]  }
   0x1   :  { %8 = vsyncpa [#allocation6], 0 }
   0x2   :  { %9 = vsyncpa [#allocation4], 0  ;;  %s616_s9 = smov [#allocation2]   ;;  %s544_s13 = scalar_lea.hbm %s681_s0, 1024 }
   0x3   :  { %s15_s10 = sshll.u32 %s616_s9, 4  ;;  %p545_p0 = scmp.ne.s32.totalorder %s681_s0, %s544_s13  ;;  %s16_s10 = int_to_ptr.vmem [resolvable:$true] %s15_s10 }
   0x4   :  { %p548_p1 = scmp.lt.u32.totalorder %s544_s13, %s681_s0 }
   0x6   :  { %p550_p2 = pnand %p548_p1, %p545_p0 }
   0x8   :  { %553 = shalt.err (!%p550_p2)
}
   0x9   :  { %s554_s18 = scalar_lea.vmem %s16_s10, 1024  ;;  %p559_p4 = scmp.lt.s32.totalorder %s16_s10, %s16_s10 }
   0xa   :  { %p555_p3 = scmp.ne.s32.totalorder %s16_s10, %s554_s18  ;;  %p560_p5 = scmp.lt.s32.totalorder %s554_s18, %s554_s18 }
   0xc   :  { %p561_p6 = por %p560_p5, %p559_p4 }
   0xe   :  { %p562_p7 = pnand %p561_p6, %p555_p3 }
  0x10   :  { %565 = shalt.err (!%p562_p7)
}
  0x11   :  { %s617_s19 = smov 64   ;;  %s618_s20 = smov 4  }
  0x12   :  { %21 = dma.hbm_to_vmem [thread:$0]  %s681_s0, 1024, %s16_s10, [#allocation3], %s617_s19, %s617_s19, %s618_s20  }
  0x13   :  { %s619_s23 = smov [#allocation5]   ;;  %s566_s27 = scalar_lea.hbm %s682_s1, 1024 }
  0x14   :  { %s27_s24 = sshll.u32 %s619_s23, 4  ;;  %p567_p8 = scmp.ne.s32.totalorder %s682_s1, %s566_s27  ;;  %s28_s24 = int_to_ptr.vmem [resolvable:$true] %s27_s24 }
  0x15   :  { %p570_p9 = scmp.lt.u32.totalorder %s566_s27, %s682_s1 }
  0x17   :  { %p572_p10 = pnand %p570_p9, %p567_p8 }
  0x19   :  { %575 = shalt.err (!%p572_p10)
}
  0x1a   :  { %s576_s4 = scalar_lea.vmem %s28_s24, 1024  ;;  %p581_p12 = scmp.lt.s32.totalorder %s28_s24, %s28_s24 }
  0x1b   :  { %p577_p11 = scmp.ne.s32.totalorder %s28_s24, %s576_s4  ;;  %p582_p13 = scmp.lt.s32.totalorder %s576_s4, %s576_s4 }
  0x1d   :  { %p583_p0 = por %p582_p13, %p581_p12 }
  0x1f   :  { %p584_p1 = pnand %p583_p0, %p577_p11 }
  0x21   :  { %587 = shalt.err (!%p584_p1)
}
  0x22   :  { %33 = dma.hbm_to_vmem [thread:$0]  %s682_s1, 1024, %s28_s24, [#allocation6], %s617_s19, %s617_s19, %s618_s20  }
  0x23   :  { %610 = dma.done.wait [#allocation3], 1024  }
  0x24   :  { %611 = vsyncadd [#allocation3], 4294966272 }
  0x25   :  { %612 = dma.done.wait [#allocation6], 1024  }
  0x26   :  { %613 = vsyncadd [#allocation6], 4294966272  ;;  %v528_v0 = vld [vmem:[#allocation5] sm:$0xff]   ;;  %v529_v1 = vld [vmem:[#allocation5 + $0x8] sm:$0xff]   ;;  %s620_s1 = smov [#allocation7]  }
  0x27   :  { %475 = vmatprep.subr.bf16.mxu0 %v528_v0  ;;  %507 = vmatprep.subr.bf16.mxu1 %v528_v0  ;;  %v530_v2 = vld [vmem:[#allocation5 + $0x10] sm:$0xff]   ;;  %v531_v3 = vld [vmem:[#allocation5 + $0x18] sm:$0xff]   ;;  %v536_v4 = vld [vmem:[#allocation2] sm:$0xff]   ;;  %s351_s6 = sshll.u32 %s620_s1, 4  ;;  %s352_s6 = int_to_ptr.vmem [resolvable:$true] %s351_s6 }
  0x28   :  { %476 = vmatpush3.bf16.msra.mxu0 %v528_v0  ;;  %515 = vmatpush3.bf16.msra.mxu1 %v528_v0  ;;  %v537_v5 = vld [vmem:[#allocation2 + $0x20] sm:$0xff]   ;;  %v533_v7 = vld [vmem:[#allocation5 + $0x28] sm:$0xff]   ;;  %v534_v8 = vld [vmem:[#allocation5 + $0x30] sm:$0xff]   ;;  %s588_s7 = scalar_lea.vmem %s352_s6, 1024  ;;  %p593_p3 = scmp.lt.s32.totalorder %s352_s6, %s352_s6 }
  0x29   :  { %477 = vmatprep.subr.bf16.mxu0 %v529_v1  ;;  %508 = vmatprep.subr.bf16.mxu1 %v529_v1  ;;  %v532_v6 = vld [vmem:[#allocation5 + $0x20] sm:$0xff]   ;;  %v535_v9 = vld [vmem:[#allocation5 + $0x38] sm:$0xff]   ;;  %v538_v10 = vld [vmem:[#allocation2 + $0x8] sm:$0xff]   ;;  %p589_p2 = scmp.ne.s32.totalorder %s352_s6, %s588_s7  ;;  %p594_p4 = scmp.lt.s32.totalorder %s588_s7, %s588_s7 }
  0x2a   :  { %491 = vmatprep.mubr.bf16.mxu0 %v536_v4  ;;  %499 = vmatprep.mubr.bf16.mxu1 %v537_v5  ;;  %v539_v11 = vld [vmem:[#allocation2 + $0x28] sm:$0xff]   ;;  %v540_v12 = vld [vmem:[#allocation2 + $0x10] sm:$0xff]   ;;  %v542_v14 = vld [vmem:[#allocation2 + $0x18] sm:$0xff]  }
  0x2b   :  { %v541_v13 = vld [vmem:[#allocation2 + $0x30] sm:$0xff]   ;;  %v543_v15 = vld [vmem:[#allocation2 + $0x38] sm:$0xff]   ;;  %p595_p5 = por %p594_p4, %p593_p3 }
  0x2c   :  { %478 = vmatpush3.bf16.msra.mxu0 %v529_v1  ;;  %516 = vmatpush3.bf16.msra.mxu1 %v529_v1 }
  0x2d   :  { %479 = vmatprep.subr.bf16.mxu0 %v530_v2  ;;  %509 = vmatprep.subr.bf16.mxu1 %v530_v2  ;;  %p596_p6 = pnand %p595_p5, %p589_p2 }
  0x30   :  { %480 = vmatpush3.bf16.msra.mxu0 %v530_v2  ;;  %517 = vmatpush3.bf16.msra.mxu1 %v530_v2 }
  0x31   :  { %481 = vmatprep.subr.bf16.mxu0 %v531_v3  ;;  %510 = vmatprep.subr.bf16.mxu1 %v531_v3 }
  0x34   :  { %482 = vmatpush3.bf16.msra.mxu0 %v531_v3  ;;  %518 = vmatpush3.bf16.msra.mxu1 %v531_v3 }
  0x35   :  { %483 = vmatprep.subr.bf16.mxu0 %v532_v6  ;;  %511 = vmatprep.subr.bf16.mxu1 %v532_v6 }
  0x38   :  { %484 = vmatpush3.bf16.msra.mxu0 %v532_v6  ;;  %519 = vmatpush3.bf16.msra.mxu1 %v532_v6 }
  0x39   :  { %485 = vmatprep.subr.bf16.mxu0 %v533_v7  ;;  %512 = vmatprep.subr.bf16.mxu1 %v533_v7 }
  0x3c   :  { %486 = vmatpush3.bf16.msra.mxu0 %v533_v7  ;;  %520 = vmatpush3.bf16.msra.mxu1 %v533_v7 }
  0x3d   :  { %487 = vmatprep.subr.bf16.mxu0 %v534_v8  ;;  %513 = vmatprep.subr.bf16.mxu1 %v534_v8 }
  0x40   :  { %488 = vmatpush3.bf16.msra.mxu0 %v534_v8  ;;  %521 = vmatpush3.bf16.msra.mxu1 %v534_v8 }
  0x41   :  { %489 = vmatprep.subr.bf16.mxu0 %v535_v9  ;;  %514 = vmatprep.subr.bf16.mxu1 %v535_v9 }
  0x44   :  { %490 = vmatpush3.bf16.msra.mxu0 %v535_v9  ;;  %522 = vmatpush3.bf16.msra.mxu1 %v535_v9 }
  0x47   :  { %492 = vmatmul.mubr.bf16.vlgmr.msra.gmra.mrb[0].mxu0 %v538_v10  ;;  %500 = vmatmul.mubr.bf16.vlgmr.msra.gmra.mrb[0].mxu1 %v539_v11 }
  0x48   :  { %495 = vmatprep.mubr.bf16.mxu0 %v540_v12  ;;  %503 = vmatprep.mubr.bf16.mxu1 %v541_v13 }
  0x4f   :  { %496 = vmatmul.mubr.bf16.gmra.mrb[4].mxu0 %v542_v14  ;;  %504 = vmatmul.mubr.bf16.gmra.mrb[4].mxu1 %v543_v15 }
 0x11a   :  { %v493_v16 = vpop.f32.mrb[0].mxu0  ;;  %v501_v17 = vpop.f32.mrb[0].mxu1 }
 0x11b   :  { %v203_v18 = vpop.f32.mrb[1].mxu0  ;;  %v235_v19 = vpop.f32.mrb[1].mxu1 }
 0x11c   :  { %v494_v20 = vpop.f32.mrb[2].mxu0  ;;  %v502_v21 = vpop.f32.mrb[2].mxu1 }
 0x11d   :  { %v420_v22 = vpack.c.bf16 %v494_v20, %v493_v16  ;;  %v440_v23 = vpack.c.bf16 %v502_v21, %v501_v17  ;;  %v206_v24 = vpop.f32.mrb[3].mxu0  ;;  %v238_v25 = vpop.f32.mrb[3].mxu1 }
 0x11e   :  { %v415_v26 = vpack.c.bf16 %v206_v24, %v203_v18  ;;  %v435_v27 = vpack.c.bf16 %v238_v25, %v235_v19 }
 0x11f   :  { %452 = vst [vmem:[#allocation7 + $0x8] sm:$0xff] %v420_v22   ;;  %456 = vst [vmem:[#allocation7 + $0x28] sm:$0xff] %v440_v23  }
 0x120   :  { %416 = vst [vmem:[#allocation7] sm:$0xff] %v415_v26   ;;  %455 = vst [vmem:[#allocation7 + $0x20] sm:$0xff] %v435_v27  }
 0x122   :  { %v497_v28 = vpop.f32.mrb[4].mxu0  ;;  %v505_v29 = vpop.f32.mrb[4].mxu1 }
 0x123   :  { %v219_v30 = vpop.f32.mrb[5].mxu0  ;;  %v251_v31 = vpop.f32.mrb[5].mxu1 }
 0x124   :  { %v498_v32 = vpop.f32.mrb[6].mxu0  ;;  %v506_v33 = vpop.f32.mrb[6].mxu1 }
 0x125   :  { %v430_v34 = vpack.c.bf16 %v498_v32, %v497_v28  ;;  %v450_v35 = vpack.c.bf16 %v506_v33, %v505_v29  ;;  %v222_v36 = vpop.f32.mrb[7].mxu0  ;;  %v254_v37 = vpop.f32.mrb[7].mxu1 }
 0x126   :  { %v425_v38 = vpack.c.bf16 %v222_v36, %v219_v30  ;;  %v445_v39 = vpack.c.bf16 %v254_v37, %v251_v31 }
 0x127   :  { %454 = vst [vmem:[#allocation7 + $0x18] sm:$0xff] %v430_v34   ;;  %458 = vst [vmem:[#allocation7 + $0x38] sm:$0xff] %v450_v35  }
 0x128   :  { %453 = vst [vmem:[#allocation7 + $0x10] sm:$0xff] %v425_v38   ;;  %457 = vst [vmem:[#allocation7 + $0x30] sm:$0xff] %v445_v39  }
 0x129   :  { %599 = shalt.err (!%p596_p6)
}
 0x12a   :  { %s600_s10 = scalar_lea.hbm %s683_s2, 1024 }
 0x12b   :  { %p601_p7 = scmp.ne.s32.totalorder %s683_s2, %s600_s10  ;;  %p604_p8 = scmp.lt.u32.totalorder %s600_s10, %s683_s2 }
 0x12d   :  { %p606_p9 = pnand %p604_p8, %p601_p7 }
 0x12f   :  { %609 = shalt.err (!%p606_p9)
}
 0x130   :  { %357 = dma.vmem_to_hbm [thread:$0]  %s352_s6, 1024, %s683_s2, [#allocation4], %s617_s19, %s617_s19, %s618_s20  }
 0x131   :  { %614 = dma.done.wait [#allocation4], 1024  }
 0x132   :  { %615 = vsyncadd [#allocation4], 4294966272 }
 0x133   :  { %361 = vsyncpa [#allocation3], 1 }
 0x134   :  { %362 = vsyncpa [#allocation6], 1 }
 0x135   :  { %363 = vsyncpa [#allocation4], 1 }

</bundles_post_ra>
